<compile_context>
chip_gen: v7x
topology: tpu7x:2x2x1
jax: 0.10.0
libtpu: 0.0.40
codegen_flags: <defaults>
</compile_context>

<pallas_src>
import functools

import jax
import jax.numpy as jnp
from jax.experimental import pallas as pl
from jax.experimental.pallas import tpu as pltpu


def _round_up(a, b):
    return (a + b - 1) // b * b


def _basic_conv2d_kernel(pt_ref, w_ref, prm_ref, o_ref, sum_ref, ssq_ref, *,
                         eps, m_true):
    """grid = (2, n_tiles).  pass 0: accumulate BN batch stats; pass 1: normalize."""
    p = pl.program_id(0)   # 0 = stats pass, 1 = normalize pass
    t = pl.program_id(1)   # M-tile index

    # Conv tile as an MXU matmul: [C_pad, K_pad] @ [K_pad, tm] -> f32 [C_pad, tm].
    conv = jnp.dot(w_ref[...], pt_ref[...], preferred_element_type=jnp.float32)

    @pl.when(p == 0)
    def _stats():
        @pl.when(t == 0)
        def _init():
            sum_ref[...] = jnp.zeros_like(sum_ref)
            ssq_ref[...] = jnp.zeros_like(ssq_ref)
        # Zero-padded M columns / K rows contribute exactly 0 (no conv bias).
        sum_ref[...] += jnp.sum(conv, axis=1, keepdims=True)
        ssq_ref[...] += jnp.sum(conv * conv, axis=1, keepdims=True)

    @pl.when(p == 1)
    def _normalize():
        inv_m = 1.0 / float(m_true)
        mean = sum_ref[...] * inv_m                                   # [C_pad, 1]
        # E[x^2]-E[x]^2 in f32, clamped at 0 to guard cancellation.
        var = jnp.maximum(ssq_ref[...] * inv_m - mean * mean, 0.0)
        inv_std = jax.lax.rsqrt(var + eps)
        prm = prm_ref[...]                                            # [C_pad, 2]
        scale = inv_std * prm[:, 0:1]            # gamma folded in
        shift = prm[:, 1:2] - mean * scale       # beta folded in
        # Single fused scale/shift + ReLU pass over the big tensor.
        o_ref[...] = jnp.maximum(conv * scale + shift, 0.0).astype(o_ref.dtype)


def _im2col_t(x_nchw, kh, kw, padding):
    """Plain-JAX glue: NCHW -> transposed patches [C_in*kh*kw, N*Ho*Wo] (stride=1)."""
    n, c, h, w = x_nchw.shape
    xp = jnp.pad(x_nchw, ((0, 0), (0, 0), (padding, padding), (padding, padding)))
    ho = h + 2 * padding - kh + 1
    wo = w + 2 * padding - kw + 1
    cols = [xp[:, :, i:i + ho, j:j + wo] for i in range(kh) for j in range(kw)]
    pt = jnp.stack(cols, axis=0).reshape(kh, kw, n, c, ho, wo)
    pt = pt.transpose(3, 0, 1, 2, 4, 5)            # [C, kh, kw, N, Ho, Wo]
    pt = pt.reshape(c * kh * kw, n * ho * wo)      # [K, M]; K order matches OIHW flatten
    return pt, ho, wo


def basic_conv2d(x_nchw, conv_w, conv_b, bn_gamma, bn_beta, *, padding=1,
                 eps=1e-5, tm=512, compute_dtype=jnp.bfloat16):
    """x_nchw: [N, C_in, H, W]; conv_w: [C_out, C_in, kh, kw] (PyTorch layout)."""
    del conv_b  # exactly cancelled by train-mode BN mean subtraction
    c_out, c_in, kh, kw = conv_w.shape
    n = x_nchw.shape[0]

    pt, ho, wo = _im2col_t(x_nchw, kh, kw, padding)      # [K, M]
    k_dim, m = pt.shape

    k_pad = _round_up(k_dim, 8)                          # sublane-align K
    c_pad = _round_up(c_out, 8)                          # sublane-align C_out
    tm = min(tm, _round_up(m, 128))                      # lane-dense M tile
    m_pad = _round_up(m, tm)
    n_tiles = m_pad // tm

    pt = jnp.pad(pt, ((0, k_pad - k_dim), (0, m_pad - m))).astype(compute_dtype)
    w2d = jnp.pad(conv_w.reshape(c_out, k_dim),
                  ((0, c_pad - c_out), (0, k_pad - k_dim))).astype(compute_dtype)
    prm = jnp.stack(
        [jnp.pad(bn_gamma.astype(jnp.float32), (0, c_pad - c_out)),
         jnp.pad(bn_beta.astype(jnp.float32), (0, c_pad - c_out))],
        axis=1)                                          # [C_pad, 2]: gamma | beta

    kernel = functools.partial(_basic_conv2d_kernel, eps=eps, m_true=m)

    out = pl.pallas_call(
        kernel,
        out_shape=jax.ShapeDtypeStruct((c_pad, m_pad), jnp.float32),
        grid_spec=pltpu.PrefetchScalarGridSpec(
            num_scalar_prefetch=0,
            grid=(2, n_tiles),
            in_specs=[
                pl.BlockSpec((k_pad, tm), lambda p, t: (0, t)),      # patches^T tile
                pl.BlockSpec((c_pad, k_pad), lambda p, t: (0, 0)),   # weights (resident)
                pl.BlockSpec((c_pad, 2), lambda p, t: (0, 0)),       # gamma/beta params
            ],
            # During pass 0 every iteration maps to block (0, 0) so the output
            # stays resident (no garbage write-backs); pass 1 walks the tiles.
            out_specs=pl.BlockSpec((c_pad, tm), lambda p, t: (0, t * p)),
            scratch_shapes=[pltpu.VMEM((c_pad, 1), jnp.float32),     # per-channel sum
                            pltpu.VMEM((c_pad, 1), jnp.float32)],    # per-channel sumsq
        ),
        compiler_params=pltpu.CompilerParams(
            dimension_semantics=("arbitrary", "arbitrary"),
            vmem_limit_bytes=32 * 1024 * 1024),
    )(pt, w2d, prm)

    # [C_out, M] -> NCHW (module boundary is PyTorch NCHW).
    out = out[:c_out, :m].reshape(c_out, n, ho, wo).transpose(1, 0, 2, 3)
    return out


def _reference(x_nchw, conv_w, conv_b, bn_gamma, bn_beta, *, padding=1, eps=1e-5):
    """Pure-JAX reference (lax conv + train-mode BN + relu)."""
    y = jax.lax.conv_general_dilated(
        x_nchw, conv_w, window_strides=(1, 1),
        padding=[(padding, padding), (padding, padding)],
        dimension_numbers=("NCHW", "OIHW", "NCHW"))
    y = y + conv_b.reshape(1, -1, 1, 1)
    mean = jnp.mean(y, axis=(0, 2, 3), keepdims=True)
    var = jnp.mean((y - mean) ** 2, axis=(0, 2, 3), keepdims=True)
    y = (y - mean) * jax.lax.rsqrt(var + eps)
    y = y * bn_gamma.reshape(1, -1, 1, 1) + bn_beta.reshape(1, -1, 1, 1)
    return jnp.maximum(y, 0.0)


if __name__ == "__main__":
    # BasicConv2d(in_channels=4, out_channels=8, kernel_size=3, padding=1)
    N, C_IN, H, W = 2, 4, 16, 16
    C_OUT, KH, KW, PAD = 8, 3, 3, 1

    key = jax.random.PRNGKey(0)
    kx, kw_, kb = jax.random.split(key, 3)

    x = jax.random.normal(kx, (N, C_IN, H, W), dtype=jnp.float32)
    conv_w = jax.random.normal(kw_, (C_OUT, C_IN, KH, KW), dtype=jnp.float32) * 0.1
    conv_b = jax.random.normal(kb, (C_OUT,), dtype=jnp.float32) * 0.1
    bn_gamma = jnp.ones((C_OUT,), dtype=jnp.float32)   # BatchNorm2d default weight
    bn_beta = jnp.zeros((C_OUT,), dtype=jnp.float32)   # BatchNorm2d default bias

    ref = _reference(x, conv_w, conv_b, bn_gamma, bn_beta, padding=PAD)

    # f32 MXU path: tight check.
    out_f32 = jax.block_until_ready(
        basic_conv2d(x, conv_w, conv_b, bn_gamma, bn_beta, padding=PAD,
                     compute_dtype=jnp.float32))
    assert out_f32.shape == (N, C_OUT, H, W), out_f32.shape
    assert jnp.allclose(out_f32, ref, atol=1e-4, rtol=1e-4), \
        float(jnp.max(jnp.abs(out_f32 - ref)))

    # bf16 MXU path (default; preferred on v6e/v7x): loose check.
    out_bf16 = jax.block_until_ready(
        basic_conv2d(x, conv_w, conv_b, bn_gamma, bn_beta, padding=PAD))
    assert out_bf16.shape == (N, C_OUT, H, W), out_bf16.shape
    assert jnp.allclose(out_bf16, ref, atol=5e-2, rtol=5e-2), \
        float(jnp.max(jnp.abs(out_bf16 - ref)))

    print("KERNEL_OK")
</pallas_src>

<mosaic_0001>
module attributes {stable_mosaic.version = 11 : i64} {
  func.func @_basic_conv2d_kernel(%arg0: i32, %arg1: i32, %arg2: memref<40x512xf32, #tpu.memory_space<vmem>>, %arg3: memref<8x40xf32, #tpu.memory_space<vmem>>, %arg4: memref<8x2xf32, #tpu.memory_space<vmem>>, %arg5: memref<8x512xf32, #tpu.memory_space<vmem>>, %arg6: memref<8x1xf32, #tpu.memory_space<vmem>>, %arg7: memref<8x1xf32, #tpu.memory_space<vmem>>) attributes {dimension_semantics = [#tpu.dimension_semantics<arbitrary>, #tpu.dimension_semantics<arbitrary>], iteration_bounds = array<i64: 2, 1>, scalar_prefetch = 0 : i64, scratch_operands = 2 : i64, tpu.core_type = #tpu.core_type<tc>, window_params = [{transform_indices = @transform_0, window_bounds = array<i64: 40, 512>}, {pipeline_mode = #tpu.pipeline_mode<synchronous>, transform_indices = @transform_1, window_bounds = array<i64: 8, 40>}, {pipeline_mode = #tpu.pipeline_mode<synchronous>, transform_indices = @transform_2, window_bounds = array<i64: 8, 2>}, {transform_indices = @transform_3, window_bounds = array<i64: 8, 512>}]} {
    %c0 = arith.constant 0 : index
    %c0_0 = arith.constant 0 : index
    %0 = vector.load %arg3[%c0, %c0_0] : memref<8x40xf32, #tpu.memory_space<vmem>>, vector<8x40xf32>
    %c0_1 = arith.constant 0 : index
    %c0_2 = arith.constant 0 : index
    %1 = vector.load %arg2[%c0_1, %c0_2] : memref<40x512xf32, #tpu.memory_space<vmem>>, vector<40x512xf32>
    %cst = arith.constant dense<0.000000e+00> : vector<8x512xf32>
    %2 = tpu.matmul %0, %1, %cst {dimension_numbers = #tpu.dot_dimension_numbers<[1], [0], [0], [1], [0, 0, 1, 1], [], []>} : vector<8x40xf32>, vector<40x512xf32>, vector<8x512xf32> -> vector<8x512xf32>
    %c0_i32 = arith.constant 0 : i32
    %3 = arith.cmpi eq, %arg0, %c0_i32 : i32
    %4 = arith.extui %3 : i1 to i32
    %c0_i32_3 = arith.constant 0 : i32
    %5 = arith.cmpi ne, %4, %c0_i32_3 : i32
    scf.if %5 {
      %c0_i32_5 = arith.constant 0 : i32
      %9 = arith.cmpi eq, %arg1, %c0_i32_5 : i32
      %10 = arith.extui %9 : i1 to i32
      %c0_i32_6 = arith.constant 0 : i32
      %11 = arith.cmpi ne, %10, %c0_i32_6 : i32
      scf.if %11 {
        %cst_17 = arith.constant 0.000000e+00 : f32
        %23 = vector.broadcast %cst_17 : f32 to vector<8x1xf32>
        %c0_18 = arith.constant 0 : index
        %c0_19 = arith.constant 0 : index
        %24 = vector.load %arg6[%c0_18, %c0_19] : memref<8x1xf32, #tpu.memory_space<vmem>>, vector<8x1xf32>
        tpu.vector_store %arg6[%c0_18, %c0_19], %23 {strides = array<i32>} : memref<8x1xf32, #tpu.memory_space<vmem>>, vector<8x1xf32>,
        %cst_20 = arith.constant 0.000000e+00 : f32
        %25 = vector.broadcast %cst_20 : f32 to vector<8x1xf32>
        %c0_21 = arith.constant 0 : index
        %c0_22 = arith.constant 0 : index
        %26 = vector.load %arg7[%c0_21, %c0_22] : memref<8x1xf32, #tpu.memory_space<vmem>>, vector<8x1xf32>
        tpu.vector_store %arg7[%c0_21, %c0_22], %25 {strides = array<i32>} : memref<8x1xf32, #tpu.memory_space<vmem>>, vector<8x1xf32>,
      } else {
      }
      %c0_7 = arith.constant 0 : index
      %c0_8 = arith.constant 0 : index
      %12 = vector.load %arg6[%c0_7, %c0_8] : memref<8x1xf32, #tpu.memory_space<vmem>>, vector<8x1xf32>
      %cst_9 = arith.constant dense<0.000000e+00> : vector<8xf32>
      %13 = vector.multi_reduction <add>, %2, %cst_9 [1] : vector<8x512xf32> to vector<8xf32>
      %14 = vector.shape_cast %13 : vector<8xf32> to vector<8x1xf32>
      %15 = arith.addf %12, %14 : vector<8x1xf32>
      %c0_10 = arith.constant 0 : index
      %c0_11 = arith.constant 0 : index
      %16 = vector.load %arg6[%c0_10, %c0_11] : memref<8x1xf32, #tpu.memory_space<vmem>>, vector<8x1xf32>
      tpu.vector_store %arg6[%c0_10, %c0_11], %15 {strides = array<i32>} : memref<8x1xf32, #tpu.memory_space<vmem>>, vector<8x1xf32>,
      %c0_12 = arith.constant 0 : index
      %c0_13 = arith.constant 0 : index
      %17 = vector.load %arg7[%c0_12, %c0_13] : memref<8x1xf32, #tpu.memory_space<vmem>>, vector<8x1xf32>
      %18 = arith.mulf %2, %2 : vector<8x512xf32>
      %cst_14 = arith.constant dense<0.000000e+00> : vector<8xf32>
      %19 = vector.multi_reduction <add>, %18, %cst_14 [1] : vector<8x512xf32> to vector<8xf32>
      %20 = vector.shape_cast %19 : vector<8xf32> to vector<8x1xf32>
      %21 = arith.addf %17, %20 : vector<8x1xf32>
      %c0_15 = arith.constant 0 : index
      %c0_16 = arith.constant 0 : index
      %22 = vector.load %arg7[%c0_15, %c0_16] : memref<8x1xf32, #tpu.memory_space<vmem>>, vector<8x1xf32>
      tpu.vector_store %arg7[%c0_15, %c0_16], %21 {strides = array<i32>} : memref<8x1xf32, #tpu.memory_space<vmem>>, vector<8x1xf32>,
    } else {
    }
    %c1_i32 = arith.constant 1 : i32
    %6 = arith.cmpi eq, %arg0, %c1_i32 : i32
    %7 = arith.extui %6 : i1 to i32
    %c0_i32_4 = arith.constant 0 : i32
    %8 = arith.cmpi ne, %7, %c0_i32_4 : i32
    scf.if %8 {
      %c0_5 = arith.constant 0 : index
      %c0_6 = arith.constant 0 : index
      %9 = vector.load %arg6[%c0_5, %c0_6] : memref<8x1xf32, #tpu.memory_space<vmem>>, vector<8x1xf32>
      %cst_7 = arith.constant 0.001953125 : f32
      %10 = vector.broadcast %cst_7 : f32 to vector<8x1xf32>
      %11 = arith.mulf %9, %10 : vector<8x1xf32>
      %c0_8 = arith.constant 0 : index
      %c0_9 = arith.constant 0 : index
      %12 = vector.load %arg7[%c0_8, %c0_9] : memref<8x1xf32, #tpu.memory_space<vmem>>, vector<8x1xf32>
      %cst_10 = arith.constant 0.001953125 : f32
      %13 = vector.broadcast %cst_10 : f32 to vector<8x1xf32>
      %14 = arith.mulf %12, %13 : vector<8x1xf32>
      %15 = arith.mulf %11, %11 : vector<8x1xf32>
      %16 = arith.subf %14, %15 : vector<8x1xf32>
      %cst_11 = arith.constant 0.000000e+00 : f32
      %17 = vector.broadcast %cst_11 : f32 to vector<8x1xf32>
      %18 = arith.maximumf %16, %17 : vector<8x1xf32>
      %cst_12 = arith.constant 9.99999974E-6 : f32
      %19 = vector.broadcast %cst_12 : f32 to vector<8x1xf32>
      %20 = arith.addf %18, %19 : vector<8x1xf32>
      %21 = math.rsqrt %20 : vector<8x1xf32>
      %c0_13 = arith.constant 0 : index
      %c0_14 = arith.constant 0 : index
      %22 = vector.load %arg4[%c0_13, %c0_14] : memref<8x2xf32, #tpu.memory_space<vmem>>, vector<8x2xf32>
      %23 = vector.extract_strided_slice %22 {offsets = [0, 0], sizes = [8, 1], strides = [1, 1]} : vector<8x2xf32> to vector<8x1xf32>
      %24 = arith.mulf %21, %23 : vector<8x1xf32>
      %25 = vector.extract_strided_slice %22 {offsets = [0, 1], sizes = [8, 1], strides = [1, 1]} : vector<8x2xf32> to vector<8x1xf32>
      %26 = arith.mulf %11, %24 : vector<8x1xf32>
      %27 = arith.subf %25, %26 : vector<8x1xf32>
      %28 = vector.broadcast %24 : vector<8x1xf32> to vector<8x512xf32>
      %29 = arith.mulf %2, %28 : vector<8x512xf32>
      %30 = vector.broadcast %27 : vector<8x1xf32> to vector<8x512xf32>
      %31 = arith.addf %29, %30 : vector<8x512xf32>
      %cst_15 = arith.constant 0.000000e+00 : f32
      %32 = vector.broadcast %cst_15 : f32 to vector<8x512xf32>
      %33 = arith.maximumf %31, %32 : vector<8x512xf32>
      %c0_16 = arith.constant 0 : index
      %c0_17 = arith.constant 0 : index
      %34 = vector.load %arg5[%c0_16, %c0_17] : memref<8x512xf32, #tpu.memory_space<vmem>>, vector<8x512xf32>
      tpu.vector_store %arg5[%c0_16, %c0_17], %33 {strides = array<i32>} : memref<8x512xf32, #tpu.memory_space<vmem>>, vector<8x512xf32>,
    } else {
    }
    return
  }
  func.func @transform_0(%arg0: i32, %arg1: i32) -> (i32, i32) {
    %c0_i32 = arith.constant 0 : i32
    %c0_i32_0 = arith.constant 0 : i32
    return %c0_i32, %arg1 : i32, i32
  }
  func.func @transform_1(%arg0: i32, %arg1: i32) -> (i32, i32) {
    %c0_i32 = arith.constant 0 : i32
    %c0_i32_0 = arith.constant 0 : i32
    %c0_i32_1 = arith.constant 0 : i32
    return %c0_i32, %c0_i32_0 : i32, i32
  }
  func.func @transform_2(%arg0: i32, %arg1: i32) -> (i32, i32) {
    %c0_i32 = arith.constant 0 : i32
    %c0_i32_0 = arith.constant 0 : i32
    %c0_i32_1 = arith.constant 0 : i32
    return %c0_i32, %c0_i32_0 : i32, i32
  }
  func.func @transform_3(%arg0: i32, %arg1: i32) -> (i32, i32) {
    %0 = arith.muli %arg1, %arg0 : i32
    %c0_i32 = arith.constant 0 : i32
    %c0_i32_0 = arith.constant 0 : i32
    return %c0_i32, %0 : i32, i32
  }
}

</mosaic_0001>

<bundles_post_ra>
// kernel: tpu_custom_call.1
= control target key start
LH: loop header
LB: loop body
LE: loop exit
PB: predicated region body
PF: predicated region fallthrough
CT: control target
= control target key end

     0   :  { %8 = vsyncpa [#allocation5], 0  ;;  %s830_s0 = inlined_call_operand.hbm [shape: f32[40,512], index: 0, kind: input, shape index: {}]   ;;  %s831_s1 = inlined_call_operand.vmem [shape: f32[8,40], index: 1, kind: input, shape index: {}]   ;;  %s832_s2 = inlined_call_operand.vmem [shape: f32[8,2], index: 2, kind: input, shape index: {}]   ;;  %s833_s3 = inlined_call_operand.hbm [shape: f32[8,512], index: 3, kind: output, shape index: {}]  }
   0x1   :  { %9 = vsyncpa [#allocation6], 0 }
   0x2   :  { %11 = vsyncpa [#allocation6 + $0x1], 0  ;;  %s724_s12 = smov 0   ;;  %s726_s13 = smov 0  }
   0x3   :  { %s728_s14 = smov 0  }
   0x4 LB: > { %s520_s15 = sadd.s32 4294967295, %s693_s14   ;;  %s521_s16 = sadd.s32 4294967294, %s693_s14   ;;  %s693_s14 = sphi %s728_s14, %s17_s14   ;;  %s689_s13 = sphi %s726_s13, %s844_s13   ;;  %s685_s12 = sphi %s724_s12, %s843_s12  }
   0x5   : > { %s29_s17 = sadd.s32 1, %s689_s13  ;;  %p522_p0 = scmp.ge.s32.totalorder %s693_s14, 1 }
   0x6   : > { %p31_p1 = scmp.ge.s32.totalorder %s29_s17, 2  ;;  %p130_p2 = scmp.lt.s32.totalorder %s693_s14, 3 }
   0x7   : > { %p746_p3 = scmp.eq.s32.totalorder %s520_s15, 0  ;;  %s695_s20 = smov [#allocation4]  }
   0x8   : > { %s846_s17 = smov (%p31_p1, %s29_s17), 0  ;;  %p752_p4 = pnand %p522_p0, %p130_p2 }
   0x9   : > { %s837_s18 = scalar_select %p746_p3, 1, 0 }
   0xa   : > { %s838_s19 = scalar_select %p752_p4, 1, 0 }
   0xb   : > { %s145_s21 = sshll.u32 %s695_s20, 4  ;;  %p558_p5 = pneg %p752_p4  ;;  %s146_s21 = int_to_ptr.vmem [resolvable:$true] %s145_s21 }
   0xc   : > { %s609_s25 = scalar_lea.hbm %s830_s0, 2560 }
   0xd   : > { %p760_p6 = pnand %p746_p3, %p558_p5  ;;  %p610_p7 = scmp.ne.s32.totalorder %s830_s0, %s609_s25 }
   0xe   : > { %p616_p11 = scmp.lt.u32.totalorder %s609_s25, %s830_s0 }
   0xf   : > { %p611_p8 = pneg %p760_p6 }
  0x11   : > { %p612_p9 = pnand %p611_p8, %p610_p7 }
  0x13   : > { %p613_p10 = pneg %p612_p9 }
  0x15   : > { %p618_p12 = pnand %p616_p11, %p613_p10 }
  0x17   : > { %621 = shalt.err (!%p618_p12)
}
  0x18   : > { %s622_s30 = scalar_lea.vmem %s146_s21, 2560  ;;  %p630_p2 = scmp.lt.s32.totalorder %s146_s21, %s146_s21 }
  0x19   : > { %p623_p13 = scmp.ne.s32.totalorder %s146_s21, %s622_s30  ;;  %p631_p5 = scmp.lt.s32.totalorder %s622_s30, %s622_s30 }
  0x1b   : > { %p625_p0 = pnand %p623_p13, %p611_p8  ;;  %p632_p3 = por %p631_p5, %p630_p2 }
  0x1d   : > { %p626_p1 = pneg %p625_p0 }
  0x1f   : > { %p633_p4 = pnand %p632_p3, %p626_p1 }
  0x21   : > { %636 = shalt.err (!%p633_p4)
}
  0x22   : > { %s696_s4 = smov 512   ;;  %s697_s5 = smov 32  }
  0x23   : > { %561 = dma.hbm_to_vmem [thread:$0]  (!%p760_p6), %s830_s0, 2560, %s146_s21, [#allocation5], %s696_s4, %s696_s4, %s697_s5  }
  0x24   : > { %p840_p7 = scmp.ne.s32.totalorder %s838_s19, 0 }
  0x25   : > { %p841_p9 = scmp.ne.s32.totalorder (!%p840_p7), %s837_s18, 0 }
  0x26   : > { %167 = sbr.rel (%p840_p7) target bundleno = 732 (0x2dc), region = 32 }
  0x2d   : > { %676 = dma.done.wait (%p841_p9), [#allocation5], 2560  }
  0x2e   : > { %678 = vsyncadd (%p841_p9), [#allocation5], 4294964736  ;;  %v698_v0 = vmov 0.0   ;;  %v191_v1 = vld [vmem:[#allocation4 + $0x8] sm:$0xff]  ;;  %v193_v3 = vld [vmem:[#allocation4 + $0x18] sm:$0xff]  ;;  %vm210_vm0 = vcmask 326656  }
  0x2f   : > { %278 = vmatprep.mubr.f32.mxu0 %v698_v0  ;;  %349 = vmatprep.mubr.f32.mxu1 %v698_v0  ;;  %v195_v2 = vld [vmem:[#allocation4 + $0x28] sm:$0xff]  ;;  %v197_v5 = vld [vmem:[#allocation4 + $0x38] sm:$0xff]  ;;  %v190_v6 = vld [vmem:[#allocation4] sm:$0xff]  ;;  %p528_p3 = scmp.ne.s32.totalorder %s685_s12, 0 }
  0x30   : > { %v534_v4 = vpack.c.bf16 %v195_v2, %v191_v1  ;;  %v194_v7 = vld [vmem:[#allocation4 + $0x20] sm:$0xff]  ;;  %v542_v8 = vpack.c.bf16 %v197_v5, %v193_v3  ;;  %v192_v10 = vld [vmem:[#allocation4 + $0x10] sm:$0xff]  ;;  %v199_v12 = vld [vmem:[#allocation4 + $0x48] sm:$0xff]  ;;  %vm364_vm1 = vcmask (!%p528_p3), 7168   ;;  %v699_v44 = vmov (!%p528_p3), 0.0  }
  0x31   : > { %v536_v9 = vpack.c.bf16 %v194_v7, %v190_v6  ;;  %v196_v11 = vld [vmem:[#allocation4 + $0x30] sm:$0xff]  ;;  %v203_v14 = vld [vmem:[#allocation4 + $0x68] sm:$0xff]  ;;  %v201_v15 = vld [vmem:[#allocation4 + $0x58] sm:$0xff]  ;;  %365 = vst.msk [vmem:[#allocation2] sm:$0xff] (!%p528_p3), %vm364_vm1, %v699_v44 }
  0x32   : > { %535 = vmatprep.subr.bf16.mxu0 %v534_v4  ;;  %v544_v13 = vpack.c.bf16 %v196_v11, %v192_v10  ;;  %v205_v16 = vld [vmem:[#allocation4 + $0x78] sm:$0xff]  ;;  %543 = vmatprep.subr.bf16.mxu1 %v542_v8  ;;  %v538_v17 = vpack.c.bf16 %v203_v14, %v199_v12  ;;  %v198_v19 = vld [vmem:[#allocation4 + $0x40] sm:$0xff]  ;;  %v200_v21 = vld [vmem:[#allocation4 + $0x50] sm:$0xff]  ;;  %366 = vst.msk [vmem:[#allocation3] sm:$0xff] (!%p528_p3), %vm364_vm1, %v699_v44 }
  0x33   : > { %537 = vmatpush1.bf16.msra.mxu0 %v536_v9  ;;  %v546_v18 = vpack.c.bf16 %v205_v16, %v201_v15  ;;  %v202_v20 = vld [vmem:[#allocation4 + $0x60] sm:$0xff]  ;;  %v204_v23 = vld [vmem:[#allocation4 + $0x70] sm:$0xff]  ;;  %v207_v25 = vld [vmem:[#allocation4 + $0x88] sm:$0xff] }
  0x34   : > { %545 = vmatpush1.bf16.msra.mxu1 %v544_v13  ;;  %v540_v22 = vpack.c.bf16 %v202_v20, %v198_v19  ;;  %539 = vmatprep.subr.bf16.mxu0 %v538_v17  ;;  %v548_v24 = vpack.c.bf16 %v204_v23, %v200_v21  ;;  %v209_v26 = vld [vmem:[#allocation4 + $0x98] sm:$0xff]  ;;  %v206_v27 = vld [vmem:[#allocation4 + $0x80] sm:$0xff]  ;;  %v208_v28 = vld [vmem:[#allocation4 + $0x90] sm:$0xff] }
  0x35   : > { %547 = vmatprep.subr.bf16.mxu1 %v546_v18  ;;  %v189_v29 = vld [vmem:[%s831_s1] sm:$0xff] }
  0x37   : > { %541 = vmatpush1.bf16.msra.mxu0 %v540_v22 }
  0x38   : > { %549 = vmatpush1.bf16.msra.mxu1 %v548_v24  ;;  %222 = vmatprep.subr.mxu0 %v207_v25  ;;  %v367_v45 = vld [vmem:[#allocation2] sm:$0xff] (!%p528_p3) }
  0x39   : > { %293 = vmatprep.subr.mxu1 %v209_v26  ;;  %v376_v48 = vld [vmem:[#allocation3] sm:$0xff] (!%p528_p3) }
  0x3b   : > { %223 = vmatpush1.msra.mxu0 %v206_v27 }
  0x3c   : > { %294 = vmatpush1.msra.mxu1 %v208_v28  ;;  %526 = vmatmul.mubr.msk.f32.vlgmr.msra.gmra.mrb[0].mxu0 %vm210_vm0, %v189_v29 }
  0x3d   : > { %527 = vmatmul.mubr.msk.f32.vlgmr.msra.gmra.mrb[0].mxu1 %vm210_vm0, %v189_v29 }
 0x10b   : > { %359 = sbr.rel (%p528_p3) target bundleno = 428 (0x1ac), region = 40 }
 0x10f   : > { %v280_v30 = vpop.f32.mrb[0].mxu0 }
 0x110   : > { %v351_v31 = vpop.f32.mrb[0].mxu1  ;;  %v282_v32 = vpop.f32.mrb[1].mxu0  ;;  %v377_v35 = vmul.f32 (!%p528_p3), %v280_v30, %v280_v30 }
 0x111   : > { %v353_v33 = vpop.f32.mrb[1].mxu1  ;;  %v368_v34 = vadd.f32 (!%p528_p3), %v282_v32, %v280_v30  ;;  %v378_v36 = vmul.f32 (!%p528_p3), %v282_v32, %v282_v32  ;;  %v379_v37 = vmul.f32 (!%p528_p3), %v351_v31, %v351_v31 }
 0x112   : > { %v380_v39 = vmul.f32 %v353_v33, %v353_v33 }
 0x113   : > { %v369_v38 = vadd.f32 %v368_v34, %v351_v31  ;;  %v381_v40 = vadd.f32 %v378_v36, %v377_v35 }
 0x115   : > { %v370_v41 = vadd.f32 %v369_v38, %v353_v33  ;;  %v382_v42 = vadd.f32 %v381_v40, %v379_v37 }
 0x117   : > { %371 = vadd.xlane.f32.xlu0 %v370_v41  ;;  %v383_v43 = vadd.f32 %v382_v42, %v380_v39 }
 0x11b   : > { %384 = vadd.xlane.f32.xlu0 %v383_v43 }
 0x1a4   : > { %v372_v46 = vpop.xlane.xlu0 %371 }
 0x1a5   : > { %v373_v47 = vadd.f32 %v372_v46, %v367_v45 }
 0x1a7   : > { %375 = vst.msk [vmem:[#allocation2] sm:$0xff] %vm364_vm1, %v373_v47 }
 0x1a8   : > { %v385_v49 = vpop.xlane.xlu0 %384 }
 0x1a9   : > { %v386_v50 = vadd.f32 %v385_v49, %v376_v48 }
 0x1ab   : > { %387 = vst.msk [vmem:[#allocation3] sm:$0xff] %vm364_vm1, %v386_v50 }
 0x1ac PF: > { %p529_p4 = scmp.ne.s32.totalorder %s685_s12, 1 }
 0x1ad   : > { %v700_v55 = vmov (!%p529_p4), 0   ;;  %v701_v60 = vmov (!%p529_p4), 1   ;;  %v401_v61 = vld [vmem:[%s832_s2] sm:$0xff] (!%p529_p4)  ;;  %s702_s12 = smov (!%p529_p4), 1  }
 0x1ae   : > { %391 = sbr.rel (%p529_p4) target bundleno = 709 (0x2c5), region = 48  ;;  %v392_v51 = vld [vmem:[#allocation2] sm:$0xff] (!%p529_p4)  ;;  %604 = vset.pattern.permute.xlu0 (!%p529_p4), %v700_v55  ;;  %605 = vset.pattern.permute.xlu1 (!%p529_p4), %v701_v60 }
 0x1af   : > { %v393_v53 = vmul.f32 (!%p529_p4), 0.001953125, %v392_v51 }
 0x1b1   : > { %v396_v56 = vmul.f32 (!%p529_p4), %v393_v53, %v393_v53 }
 0x1b2   : > { %v394_v52 = vld [vmem:[#allocation3] sm:$0xff] (!%p529_p4) }
 0x1b3   : > { %v395_v54 = vmul.f32 (!%p529_p4), 0.001953125, %v394_v52 }
 0x1b5   : > { %v397_v57 = vsub.f32 %v395_v54, %v396_v56 }
 0x1b7   : > { %v398_v58 = vmax.f32 %v397_v57, 0.0 }
 0x1b9   : > { %v399_v59 = vadd.f32 1e-05, %v398_v58 }
 0x1bb   : > { %607 = vrsqrt.f32 %v399_v59 }
 0x1c5   : > { %v608_v62 = vpop.eup %607 }
 0x1c6   : > { %v402_v63 = vmul.f32 %v608_v62, %v401_v61 }
 0x1c8   : > { %v403_v0 = vmul.f32 %v402_v63, %v393_v53 }
 0x1ca   : > { %405 = vrot.lane.b32.xlu0 %v403_v0, %s702_s12 }
 0x1ce   : > { %411 = vperm.xlu0 %604, %v402_v63  }
 0x1d2   : > { %606 = vset.pattern.permute.xlu0 %v701_v60 }
 0x23c   : > { %v406_v1 = vpop.permute.xlu0 %405 }
 0x23d   : > { %v408_v2 = vsub.f32 %v401_v61, %v406_v1 }
 0x23f   : > { %420 = vperm.xlu1 %605, %v408_v2  }
 0x24d   : > { %v412_v3 = vpop.permute.xlu0 %411 }
 0x24e   : > { %v414_v4 = vmul.f32 %v412_v3, %v280_v30  ;;  %v415_v5 = vmul.f32 %v412_v3, %v282_v32  ;;  %v416_v6 = vmul.f32 %v412_v3, %v351_v31  ;;  %v417_v7 = vmul.f32 %v412_v3, %v353_v33 }
 0x2be   : > { %v421_v8 = vpop.permute.xlu1 %420 }
 0x2bf   : > { %v423_v9 = vadd.f32 %v421_v8, %v414_v4  ;;  %v424_v10 = vadd.f32 %v421_v8, %v415_v5  ;;  %v425_v11 = vadd.f32 %v421_v8, %v416_v6  ;;  %v426_v12 = vadd.f32 %v421_v8, %v417_v7 }
 0x2c1   : > { %v427_v13 = vmax.f32 %v423_v9, 0.0  ;;  %v428_v14 = vmax.f32 %v424_v10, 0.0  ;;  %v429_v15 = vmax.f32 %v425_v11, 0.0  ;;  %v430_v16 = vmax.f32 %v426_v12, 0.0 }
 0x2c3   : > { %431 = vst [vmem:[#allocation7] sm:$0xff] %v427_v13  ;;  %432 = vst [vmem:[#allocation7 + $0x8] sm:$0xff] %v428_v14 }
 0x2c4   : > { %433 = vst [vmem:[#allocation7 + $0x10] sm:$0xff] %v429_v15  ;;  %434 = vst [vmem:[#allocation7 + $0x18] sm:$0xff] %v430_v16 }
 0x2c5 PF: > { %p796_p6 = scmp.eq.s32.totalorder %s520_s15, 1  ;;  %s703_s19 = smov [#allocation7]  }
 0x2c6   : > { %s451_s20 = sshll.u32 %s703_s19, 4  ;;  %s452_s20 = int_to_ptr.vmem [resolvable:$true] %s451_s20 }
 0x2c7   : > { %s637_s21 = scalar_lea.vmem %s452_s20, 512  ;;  %s643_s22 = scalar_lea.vmem %s452_s20, 1024 }
 0x2c8   : > { %p638_p8 = scmp.ne.s32.totalorder %s452_s20, %s637_s21  ;;  %p644_p12 = scmp.lt.s32.totalorder %s452_s20, %s452_s20 }
 0x2c9   : > { %p645_p13 = scmp.lt.s32.totalorder %s643_s22, %s637_s21 }
 0x2ca   : > { %p639_p10 = pnand %p638_p8, %p796_p6 }
 0x2cb   : > { %p646_p0 = por %p645_p13, %p644_p12 }
 0x2cc   : > { %p640_p11 = pneg %p639_p10 }
 0x2ce   : > { %p647_p1 = pnand %p646_p0, %p640_p11 }
 0x2d0   : > { %650 = shalt.err (!%p647_p1)
}
 0x2d1   : > { %s651_s24 = scalar_lea.hbm %s833_s3, 512 }
 0x2d2   : > { %p652_p2 = scmp.ne.s32.totalorder %s833_s3, %s651_s24  ;;  %p657_p9 = scmp.lt.u32.totalorder %s651_s24, %s833_s3 }
 0x2d4   : > { %p653_p5 = pnand %p652_p2, %p796_p6 }
 0x2d6   : > { %p654_p7 = pneg %p653_p5 }
 0x2d8   : > { %p659_p3 = pnand %p657_p9, %p654_p7 }
 0x2da   : > { %662 = shalt.err (!%p659_p3)
}
 0x2db   : > { %555 = dma.vmem_to_hbm [thread:$0]  (%p796_p6), %s452_s20, 512, %s833_s3, [#allocation6]  }
 0x2dc PF: > { %p569_p4 = scmp.ge.s32.totalorder %s693_s14, 2  ;;  %p570_p8 = scmp.eq.s32.totalorder %s521_s16, 1 }
 0x2de   : > { %p563_p10 = pnand %p570_p8, %p569_p4 }
 0x2e0   : > { %680 = dma.done.wait (!%p563_p10), [#allocation6], 512  }
 0x2e1   : > { %682 = vsyncadd (!%p563_p10), [#allocation6], 4294966784  ;;  %s17_s14 = sadd.s32 1, %s693_s14   ;;  %s843_s12 = smov %s689_s13 }
 0x2e2   : > { %p14_p11 = scmp.ge.s32.totalorder %s17_s14, 4   ;;  %s844_s13 = smov %s846_s17 }
 0x2e4   :  { %16 = sbr.rel (!%p14_p11) target bundleno = 4 (0x4), region = 82 }
 0x2eb   :  { %469 = vsyncpa [#allocation5], 1 }
 0x2ec   :  { %471 = vsyncpa [#allocation5 + $0x1], 1 }
 0x2ed   :  { %472 = vsyncpa [#allocation6], 1 }
 0x2ee   :  { %474 = vsyncpa [#allocation6 + $0x1], 1 }

</bundles_post_ra>
